<compile_context>
chip_gen: v6e
topology: v6e:2x2x1
jax: 0.10.0
libtpu: 0.0.40
codegen_flags: <defaults>
</compile_context>

<pallas_src>
import jax
import jax.numpy as jnp
from jax.experimental import pallas as pl
from jax.experimental.pallas import tpu as pltpu

LANE = 128          # vreg lane width; feature dims padded to this
NUM_LAYERS = 4


# ----------------------------- Pallas kernel --------------------------------
def _make_fused_gnn_kernel(split_dot: bool):
    """Build the fused 4-layer SAGE kernel.

    split_dot=True  -> two K=128 matmuls per layer (v5e: 128-deep MXU, concat buys nothing)
    split_dot=False -> one merged K=256 matmul per layer (v6e/v7x: 256-deep MXU)
    """

    def kernel(a_ref, invd_ref, x_ref, w_ref, b_ref, o_ref):
        a = a_ref[...]          # (N, N)   bf16 exact edge counts, resident for all 4 layers
        inv_d = invd_ref[...]   # (N, 1)   f32 1/in-degree (normalization stays in f32)
        h = x_ref[...]          # (N, 128) bf16 activation, resident for all 4 layers

        def sage_layer(h_bf16, layer, apply_relu):
            # Neighbor SUM on the MXU (f32 accumulate), mean normalization in f32 epilogue.
            agg = jnp.dot(a, h_bf16, preferred_element_type=jnp.float32) * inv_d  # (N, 128)
            w = w_ref[layer]                                   # (256, 128) bf16 = [Wl ; Wr]
            if split_dot:
                out = (jnp.dot(agg.astype(jnp.bfloat16), w[:LANE, :],
                               preferred_element_type=jnp.float32)
                       + jnp.dot(h_bf16, w[LANE:, :],
                                 preferred_element_type=jnp.float32))
            else:
                cat = jnp.concatenate([agg.astype(jnp.bfloat16), h_bf16], axis=1)  # (N, 256)
                out = jnp.dot(cat, w, preferred_element_type=jnp.float32)           # (N, 128)
            out = out + b_ref[layer]                           # (1, 128) f32 bias, f32 epilogue
            if apply_relu:
                out = jnp.maximum(out, 0.0)
            return out

        h = sage_layer(h, 0, True).astype(jnp.bfloat16)
        h = sage_layer(h, 1, True).astype(jnp.bfloat16)
        h = sage_layer(h, 2, True).astype(jnp.bfloat16)
        o_ref[...] = sage_layer(h, 3, False).astype(o_ref.dtype)

    return kernel


def make_gnn_forward(split_dot: bool):
    kernel = _make_fused_gnn_kernel(split_dot)

    @jax.jit
    def forward(a, inv_deg, x_pad, w_stack, b_stack):
        n = x_pad.shape[0]
        flops = NUM_LAYERS * (2 * n * n * LANE + 2 * n * (2 * LANE) * LANE)
        bytes_accessed = (a.size * 2 + inv_deg.size * 4 + x_pad.size * 2
                          + w_stack.size * 2 + b_stack.size * 4 + n * LANE * 4)
        vmem_spec = pl.BlockSpec(memory_space=pltpu.MemorySpace.VMEM)
        # Tiny problem: every operand fits in VMEM -> full-array blocks, no grid;
        # all 4 layers run in a single invocation with A/h/W/b VMEM-resident.
        return pl.pallas_call(
            kernel,
            out_shape=jax.ShapeDtypeStruct((n, LANE), jnp.float32),
            in_specs=[vmem_spec] * 5,
            out_specs=vmem_spec,
            cost_estimate=pl.CostEstimate(flops=flops, transcendentals=0,
                                          bytes_accessed=bytes_accessed),
        )(a, inv_deg, x_pad, w_stack, b_stack)

    return forward


# ------------------------------ one-time prep --------------------------------
def _pad2(arr, rows, cols):
    return jnp.pad(arr, ((0, rows - arr.shape[0]), (0, cols - arr.shape[1])))


def prepare_gnn_operands(params, x, edge_index, num_nodes):
    """One-time host-side prep (hoisted OUT of the per-call jitted graph)."""
    src, dst = edge_index[0], edge_index[1]
    counts = jnp.zeros((num_nodes, num_nodes), jnp.float32).at[dst, src].add(1.0)
    deg = counts.sum(axis=1, keepdims=True)
    inv_deg = (1.0 / jnp.maximum(deg, 1.0)).astype(jnp.float32)          # (N, 1) f32
    a = counts.astype(jnp.bfloat16)                                      # small ints: exact in bf16
    x_pad = _pad2(x, num_nodes, LANE).astype(jnp.bfloat16)               # (N, 128) bf16

    ws, bs = [], []
    for p in params:
        wl_p = _pad2(p["wl"], LANE, LANE)
        wr_p = _pad2(p["wr"], LANE, LANE)
        ws.append(jnp.concatenate([wl_p, wr_p], axis=0).astype(jnp.bfloat16))  # (256, 128)
        bs.append(_pad2(p["bl"], 1, LANE).astype(jnp.float32))                 # (1, 128)
    w_stack = jnp.stack(ws)   # (4, 256, 128) bf16
    b_stack = jnp.stack(bs)   # (4, 1, 128)   f32
    return a, inv_deg, x_pad, w_stack, b_stack


def _use_split_dot():
    """v5e MXU is 128x128: a K=256 matmul is split internally anyway, skip the concat."""
    try:
        kind = jax.devices()[0].device_kind.lower()
    except Exception:
        return False
    return ("v5 lite" in kind) or ("v5e" in kind) or ("v5litepod" in kind)


# --------------------------- params / reference ------------------------------
def init_sage_params(key, in_channels, out_channels):
    k1, k2, k3 = jax.random.split(key, 3)
    scale = 1.0 / jnp.sqrt(jnp.float32(in_channels))
    wl = jax.random.normal(k1, (in_channels, out_channels), jnp.float32) * scale
    bl = jax.random.normal(k2, (1, out_channels), jnp.float32) * 0.01
    wr = jax.random.normal(k3, (in_channels, out_channels), jnp.float32) * scale
    return {"wl": wl, "bl": bl, "wr": wr}


def gnn_encoder_init(key, in_channels, hidden_channels, out_channels):
    ks = jax.random.split(key, 4)
    return [
        init_sage_params(ks[0], in_channels, hidden_channels),   # conv1
        init_sage_params(ks[1], hidden_channels, out_channels),  # conv2
        init_sage_params(ks[2], out_channels, out_channels),     # conv3
        init_sage_params(ks[3], out_channels, out_channels),     # conv4
    ]


def gnn_encoder_reference(params, x, edge_index):
    """Plain-JAX f32 reference (same semantics) for a bf16-tolerance check."""
    n = x.shape[0]
    src, dst = edge_index[0], edge_index[1]
    counts = jnp.zeros((n, n), jnp.float32).at[dst, src].add(1.0)
    deg = counts.sum(axis=1, keepdims=True)
    a = counts / jnp.maximum(deg, 1.0)
    h = x
    for i, p in enumerate(params):
        out = (a @ h) @ p["wl"] + p["bl"] + h @ p["wr"]
        h = jnp.maximum(out, 0.0) if i < len(params) - 1 else out
    return h


# --------------------------------- main --------------------------------------
if __name__ == "__main__":
    key = jax.random.PRNGKey(0)
    k_x, k_e, k_p = jax.random.split(key, 3)

    num_nodes = 32
    in_channels = 16
    hidden_channels = 32
    out_channels = 32
    num_edges = 64

    x = jax.random.normal(k_x, (num_nodes, in_channels), jnp.float32)
    edge_index = jax.random.randint(k_e, (2, num_edges), 0, num_nodes, jnp.int32)
    params = gnn_encoder_init(k_p, in_channels, hidden_channels, out_channels)

    # One-time prep: adjacency counts, inv-degree, padded/stacked weights.
    operands = prepare_gnn_operands(params, x, edge_index, num_nodes)
    operands = jax.block_until_ready(operands)

    forward = make_gnn_forward(split_dot=_use_split_dot())
    out_pad = forward(*operands)              # (N, 128) lane-dense padded slab
    jax.block_until_ready(out_pad)

    assert out_pad.shape == (num_nodes, LANE)
    assert out_pad.dtype == jnp.float32

    # Consumer-side un-pad (kept outside the jitted kernel call).
    out = out_pad[:, :out_channels]

    # Correctness vs f32 reference (bf16 matmul operands, f32 accumulate/normalize).
    ref = gnn_encoder_reference(params, x, edge_index)
    err = float(jnp.max(jnp.abs(out - ref)))
    tol = 0.03 * (float(jnp.max(jnp.abs(ref))) + 1.0)
    assert err <= tol, f"max abs err {err} > tol {tol}"
    # Padded lanes must stay exactly zero (zero-padded W/b, ReLU(0)=0).
    assert float(jnp.max(jnp.abs(out_pad[:, out_channels:]))) == 0.0

    print("KERNEL_OK")
</pallas_src>

<mosaic_0001>
module attributes {stable_mosaic.version = 11 : i64} {
  func.func @kernel(%arg0: memref<32x32xbf16, #tpu.memory_space<vmem>>, %arg1: memref<32x1xf32, #tpu.memory_space<vmem>>, %arg2: memref<32x128xbf16, #tpu.memory_space<vmem>>, %arg3: memref<4x256x128xbf16, #tpu.memory_space<vmem>>, %arg4: memref<4x1x128xf32, #tpu.memory_space<vmem>>, %arg5: memref<32x128xf32, #tpu.memory_space<vmem>>) attributes {dimension_semantics = [], scalar_prefetch = 0 : i64, scratch_operands = 0 : i64, tpu.core_type = #tpu.core_type<tc>} {
    %c0 = arith.constant 0 : index
    %c0_0 = arith.constant 0 : index
    %0 = vector.load %arg0[%c0, %c0_0] : memref<32x32xbf16, #tpu.memory_space<vmem>>, vector<32x32xbf16>
    %c0_1 = arith.constant 0 : index
    %c0_2 = arith.constant 0 : index
    %1 = vector.load %arg1[%c0_1, %c0_2] : memref<32x1xf32, #tpu.memory_space<vmem>>, vector<32x1xf32>
    %c0_3 = arith.constant 0 : index
    %c0_4 = arith.constant 0 : index
    %2 = vector.load %arg2[%c0_3, %c0_4] : memref<32x128xbf16, #tpu.memory_space<vmem>>, vector<32x128xbf16>
    %cst = arith.constant dense<0.000000e+00> : vector<32x128xf32>
    %3 = tpu.matmul %0, %2, %cst {dimension_numbers = #tpu.dot_dimension_numbers<[1], [0], [0], [1], [0, 0, 1, 1], [], []>} : vector<32x32xbf16>, vector<32x128xbf16>, vector<32x128xf32> -> vector<32x128xf32>
    %4 = vector.broadcast %1 : vector<32x1xf32> to vector<32x128xf32>
    %5 = arith.mulf %3, %4 : vector<32x128xf32>
    %c0_5 = arith.constant 0 : index
    %c0_6 = arith.constant 0 : index
    %c0_7 = arith.constant 0 : index
    %6 = vector.load %arg3[%c0_5, %c0_6, %c0_7] : memref<4x256x128xbf16, #tpu.memory_space<vmem>>, vector<1x256x128xbf16>
    %7 = vector.shape_cast %6 : vector<1x256x128xbf16> to vector<256x128xbf16>
    %8 = arith.truncf %5 : vector<32x128xf32> to vector<32x128xbf16>
    %9 = tpu.concatenate %8, %2 in 1 : vector<32x128xbf16>, vector<32x128xbf16> -> vector<32x256xbf16>
    %cst_8 = arith.constant dense<0.000000e+00> : vector<32x128xf32>
    %10 = tpu.matmul %9, %7, %cst_8 {dimension_numbers = #tpu.dot_dimension_numbers<[1], [0], [0], [1], [0, 0, 1, 1], [], []>} : vector<32x256xbf16>, vector<256x128xbf16>, vector<32x128xf32> -> vector<32x128xf32>
    %c0_9 = arith.constant 0 : index
    %c0_10 = arith.constant 0 : index
    %c0_11 = arith.constant 0 : index
    %11 = vector.load %arg4[%c0_9, %c0_10, %c0_11] : memref<4x1x128xf32, #tpu.memory_space<vmem>>, vector<1x1x128xf32>
    %12 = vector.shape_cast %11 : vector<1x1x128xf32> to vector<1x128xf32>
    %13 = vector.broadcast %12 : vector<1x128xf32> to vector<32x128xf32>
    %14 = arith.addf %10, %13 : vector<32x128xf32>
    %cst_12 = arith.constant 0.000000e+00 : f32
    %15 = vector.broadcast %cst_12 : f32 to vector<32x128xf32>
    %16 = arith.maximumf %14, %15 : vector<32x128xf32>
    %17 = arith.truncf %16 : vector<32x128xf32> to vector<32x128xbf16>
    %cst_13 = arith.constant dense<0.000000e+00> : vector<32x128xf32>
    %18 = tpu.matmul %0, %17, %cst_13 {dimension_numbers = #tpu.dot_dimension_numbers<[1], [0], [0], [1], [0, 0, 1, 1], [], []>} : vector<32x32xbf16>, vector<32x128xbf16>, vector<32x128xf32> -> vector<32x128xf32>
    %19 = vector.broadcast %1 : vector<32x1xf32> to vector<32x128xf32>
    %20 = arith.mulf %18, %19 : vector<32x128xf32>
    %c1 = arith.constant 1 : index
    %c0_14 = arith.constant 0 : index
    %c0_15 = arith.constant 0 : index
    %21 = vector.load %arg3[%c1, %c0_14, %c0_15] : memref<4x256x128xbf16, #tpu.memory_space<vmem>>, vector<1x256x128xbf16>
    %22 = vector.shape_cast %21 : vector<1x256x128xbf16> to vector<256x128xbf16>
    %23 = arith.truncf %20 : vector<32x128xf32> to vector<32x128xbf16>
    %24 = tpu.concatenate %23, %17 in 1 : vector<32x128xbf16>, vector<32x128xbf16> -> vector<32x256xbf16>
    %cst_16 = arith.constant dense<0.000000e+00> : vector<32x128xf32>
    %25 = tpu.matmul %24, %22, %cst_16 {dimension_numbers = #tpu.dot_dimension_numbers<[1], [0], [0], [1], [0, 0, 1, 1], [], []>} : vector<32x256xbf16>, vector<256x128xbf16>, vector<32x128xf32> -> vector<32x128xf32>
    %c1_17 = arith.constant 1 : index
    %c0_18 = arith.constant 0 : index
    %c0_19 = arith.constant 0 : index
    %26 = vector.load %arg4[%c1_17, %c0_18, %c0_19] : memref<4x1x128xf32, #tpu.memory_space<vmem>>, vector<1x1x128xf32>
    %27 = vector.shape_cast %26 : vector<1x1x128xf32> to vector<1x128xf32>
    %28 = vector.broadcast %27 : vector<1x128xf32> to vector<32x128xf32>
    %29 = arith.addf %25, %28 : vector<32x128xf32>
    %cst_20 = arith.constant 0.000000e+00 : f32
    %30 = vector.broadcast %cst_20 : f32 to vector<32x128xf32>
    %31 = arith.maximumf %29, %30 : vector<32x128xf32>
    %32 = arith.truncf %31 : vector<32x128xf32> to vector<32x128xbf16>
    %cst_21 = arith.constant dense<0.000000e+00> : vector<32x128xf32>
    %33 = tpu.matmul %0, %32, %cst_21 {dimension_numbers = #tpu.dot_dimension_numbers<[1], [0], [0], [1], [0, 0, 1, 1], [], []>} : vector<32x32xbf16>, vector<32x128xbf16>, vector<32x128xf32> -> vector<32x128xf32>
    %34 = vector.broadcast %1 : vector<32x1xf32> to vector<32x128xf32>
    %35 = arith.mulf %33, %34 : vector<32x128xf32>
    %c2 = arith.constant 2 : index
    %c0_22 = arith.constant 0 : index
    %c0_23 = arith.constant 0 : index
    %36 = vector.load %arg3[%c2, %c0_22, %c0_23] : memref<4x256x128xbf16, #tpu.memory_space<vmem>>, vector<1x256x128xbf16>
    %37 = vector.shape_cast %36 : vector<1x256x128xbf16> to vector<256x128xbf16>
    %38 = arith.truncf %35 : vector<32x128xf32> to vector<32x128xbf16>
    %39 = tpu.concatenate %38, %32 in 1 : vector<32x128xbf16>, vector<32x128xbf16> -> vector<32x256xbf16>
    %cst_24 = arith.constant dense<0.000000e+00> : vector<32x128xf32>
    %40 = tpu.matmul %39, %37, %cst_24 {dimension_numbers = #tpu.dot_dimension_numbers<[1], [0], [0], [1], [0, 0, 1, 1], [], []>} : vector<32x256xbf16>, vector<256x128xbf16>, vector<32x128xf32> -> vector<32x128xf32>
    %c2_25 = arith.constant 2 : index
    %c0_26 = arith.constant 0 : index
    %c0_27 = arith.constant 0 : index
    %41 = vector.load %arg4[%c2_25, %c0_26, %c0_27] : memref<4x1x128xf32, #tpu.memory_space<vmem>>, vector<1x1x128xf32>
    %42 = vector.shape_cast %41 : vector<1x1x128xf32> to vector<1x128xf32>
    %43 = vector.broadcast %42 : vector<1x128xf32> to vector<32x128xf32>
    %44 = arith.addf %40, %43 : vector<32x128xf32>
    %cst_28 = arith.constant 0.000000e+00 : f32
    %45 = vector.broadcast %cst_28 : f32 to vector<32x128xf32>
    %46 = arith.maximumf %44, %45 : vector<32x128xf32>
    %47 = arith.truncf %46 : vector<32x128xf32> to vector<32x128xbf16>
    %cst_29 = arith.constant dense<0.000000e+00> : vector<32x128xf32>
    %48 = tpu.matmul %0, %47, %cst_29 {dimension_numbers = #tpu.dot_dimension_numbers<[1], [0], [0], [1], [0, 0, 1, 1], [], []>} : vector<32x32xbf16>, vector<32x128xbf16>, vector<32x128xf32> -> vector<32x128xf32>
    %49 = vector.broadcast %1 : vector<32x1xf32> to vector<32x128xf32>
    %50 = arith.mulf %48, %49 : vector<32x128xf32>
    %c3 = arith.constant 3 : index
    %c0_30 = arith.constant 0 : index
    %c0_31 = arith.constant 0 : index
    %51 = vector.load %arg3[%c3, %c0_30, %c0_31] : memref<4x256x128xbf16, #tpu.memory_space<vmem>>, vector<1x256x128xbf16>
    %52 = vector.shape_cast %51 : vector<1x256x128xbf16> to vector<256x128xbf16>
    %53 = arith.truncf %50 : vector<32x128xf32> to vector<32x128xbf16>
    %54 = tpu.concatenate %53, %47 in 1 : vector<32x128xbf16>, vector<32x128xbf16> -> vector<32x256xbf16>
    %cst_32 = arith.constant dense<0.000000e+00> : vector<32x128xf32>
    %55 = tpu.matmul %54, %52, %cst_32 {dimension_numbers = #tpu.dot_dimension_numbers<[1], [0], [0], [1], [0, 0, 1, 1], [], []>} : vector<32x256xbf16>, vector<256x128xbf16>, vector<32x128xf32> -> vector<32x128xf32>
    %c3_33 = arith.constant 3 : index
    %c0_34 = arith.constant 0 : index
    %c0_35 = arith.constant 0 : index
    %56 = vector.load %arg4[%c3_33, %c0_34, %c0_35] : memref<4x1x128xf32, #tpu.memory_space<vmem>>, vector<1x1x128xf32>
    %57 = vector.shape_cast %56 : vector<1x1x128xf32> to vector<1x128xf32>
    %58 = vector.broadcast %57 : vector<1x128xf32> to vector<32x128xf32>
    %59 = arith.addf %55, %58 : vector<32x128xf32>
    %c0_36 = arith.constant 0 : index
    %c0_37 = arith.constant 0 : index
    %60 = vector.load %arg5[%c0_36, %c0_37] : memref<32x128xf32, #tpu.memory_space<vmem>>, vector<32x128xf32>
    tpu.vector_store %arg5[%c0_36, %c0_37], %59 {strides = array<i32>} : memref<32x128xf32, #tpu.memory_space<vmem>>, vector<32x128xf32>,
    return
  }
}

</mosaic_0001>

<bundles_post_ra>
// kernel: forward.1
= control target key start
LH: loop header
LB: loop body
LE: loop exit
PB: predicated region body
PF: predicated region fallthrough
CT: control target
= control target key end

     0   :  { %10 = vsyncpa [#allocation3], 0  ;;  %s1590_s0 = inlined_call_operand.vmem [shape: bf16[32,32], index: 0, kind: input, shape index: {}]   ;;  %s1591_s1 = inlined_call_operand.vmem [shape: f32[32,1], index: 1, kind: input, shape index: {}]   ;;  %s1592_s2 = inlined_call_operand.vmem [shape: bf16[32,128], index: 2, kind: input, shape index: {}]   ;;  %s1593_s3 = inlined_call_operand.hbm [shape: bf16[4,256,128], index: 3, kind: input, shape index: {}]   ;;  %s1594_s4 = inlined_call_operand.vmem [shape: f32[4,1,128], index: 4, kind: input, shape index: {}]   ;;  %s1595_s5 = inlined_call_operand.hbm [shape: f32[32,128], index: 5, kind: output, shape index: {}]  }
   0x1   :  { %11 = vsyncpa [#allocation4], 0  ;;  %s1462_s18 = smov [#allocation2]  }
   0x2   :  { %s23_s19 = sshll.u32 %s1462_s18, 4  ;;  %s24_s19 = int_to_ptr.vmem [resolvable:$true] %s23_s19 }
   0x3   :  { %s1426_s20 = scalar_lea.vmem %s24_s19, 8192  ;;  %p1431_p1 = scmp.lt.s32.totalorder %s24_s19, %s24_s19 }
   0x4   :  { %p1427_p0 = scmp.ne.s32.totalorder %s24_s19, %s1426_s20  ;;  %p1432_p2 = scmp.lt.s32.totalorder %s1426_s20, %s1426_s20 }
   0x6   :  { %p1433_p3 = por %p1432_p2, %p1431_p1 }
   0x8   :  { %p1434_p4 = pnand %p1433_p3, %p1427_p0 }
   0xa   :  { %1437 = shalt.err (!%p1434_p4)
}
   0xb   :  { %s1463_s21 = smov 64   ;;  %s1464_s22 = smov 4  }
   0xc   :  { %29 = dma.hbm_to_vmem [thread:$0]  %s1593_s3, 8192, %s24_s19, [#allocation3], %s1463_s21, %s1463_s21, %s1464_s22  }
   0xd   :  { %1458 = dma.done.wait [#allocation3], 8192  }
   0xe   :  { %1459 = vsyncadd [#allocation3], 4294959104  ;;  %v1465_v0 = vmov 0   ;;  %v1505_v1 = vld [vmem:[%s1592_s2 + $0x8] sm:$0xff]   ;;  %v1351_v2 = vld [vmem:[%s1592_s2] sm:$0xff]   ;;  %vm70_vm0 = vcmask 261120  }
   0xf   :  { %1348 = vset.pattern.permute.xlu0 %v1465_v0  ;;  %1349 = vset.pattern.permute.xlu1 %v1465_v0  ;;  %v1514_v3 = vld [vmem:[%s1590_s0] sm:$0xff]   ;;  %v1522_v4 = vld [vmem:[%s1590_s0 + $0x8] sm:$0xff]   ;;  %v42_v6 = vld [vmem:[%s1591_s1 + $0x10] sm:$0xff]  ;;  %s1466_s20 = smov [#allocation5]  }
  0x10   :  { %1309 = vmatprep.subr.bf16.mxu0 %v1505_v1  ;;  %319 = vmatprep.mubr.bf16.mxu1 %v1351_v2  ;;  %v40_v5 = vld [vmem:[%s1591_s1] sm:$0xff]  ;;  %v41_v7 = vld [vmem:[%s1591_s1 + $0x8] sm:$0xff]  ;;  %v43_v8 = vld [vmem:[%s1591_s1 + $0x18] sm:$0xff]  ;;  %s1086_s21 = sshll.u32 %s1466_s20, 4  ;;  %s1087_s21 = int_to_ptr.vmem [resolvable:$true] %s1086_s21 }
  0x11   :  { %1310 = vmatpush3.bf16.msra.mxu0 %v1505_v1  ;;  %1313 = vmatprep.mubr.msk.bf16.mxu0 %vm70_vm0, %v1514_v3  ;;  %v1354_v9 = vld [vmem:[#allocation2 + $0x78] sm:$0xff]   ;;  %v1356_v11 = vld [vmem:[#allocation2 + $0x70] sm:$0xff]   ;;  %v1358_v13 = vld [vmem:[#allocation2 + $0x68] sm:$0xff]   ;;  %p1443_p6 = scmp.lt.s32.totalorder %s1087_s21, %s1087_s21 }
  0x12   :  { %1311 = vmatprep.subr.bf16.mxu0 %v1351_v2  ;;  %128 = vperm.xlu0 %1348, %v40_v5   ;;  %v1355_v10 = vld [vmem:[#allocation2 + $0x38] sm:$0xff]   ;;  %v1357_v12 = vld [vmem:[#allocation2 + $0x30] sm:$0xff]   ;;  %v1359_v14 = vld [vmem:[#allocation2 + $0x28] sm:$0xff]  }
  0x13   :  { %138 = vperm.xlu1 %1349, %v42_v6   ;;  %1185 = vmatprep.subr.bf16.mxu1 %v1354_v9  ;;  %v1360_v15 = vld [vmem:[#allocation2 + $0x60] sm:$0xff]   ;;  %v1362_v17 = vld [vmem:[#allocation2 + $0x58] sm:$0xff]   ;;  %v1364_v19 = vld [vmem:[#allocation2 + $0x50] sm:$0xff]  }
  0x14   :  { %1186 = vmatpush3.bf16.msra.mxu1 %v1355_v10  ;;  %v1361_v16 = vld [vmem:[#allocation2 + $0x20] sm:$0xff]   ;;  %v1363_v18 = vld [vmem:[#allocation2 + $0x18] sm:$0xff]   ;;  %v1365_v20 = vld [vmem:[#allocation2 + $0x10] sm:$0xff]  }
  0x15   :  { %1312 = vmatpush3.bf16.msra.mxu0 %v1351_v2  ;;  %1187 = vmatprep.subr.bf16.mxu1 %v1356_v11  ;;  %v1366_v21 = vld [vmem:[#allocation2 + $0x48] sm:$0xff]   ;;  %v1368_v23 = vld [vmem:[#allocation2 + $0x40] sm:$0xff]   ;;  %v1370_v62 = vld [vmem:[#allocation2 + $0xf8] sm:$0xff]  }
  0x16   :  { %133 = vperm.xlu0 %1348, %v41_v7   ;;  %v1367_v22 = vld [vmem:[#allocation2 + $0x8] sm:$0xff]   ;;  %v1369_v24 = vld [vmem:[#allocation2] sm:$0xff]   ;;  %v1371_v63 = vld [vmem:[#allocation2 + $0xb8] sm:$0xff]  }
  0x17   :  { %143 = vperm.xlu1 %1349, %v43_v8   ;;  %v1104_v49 = vld [vmem:[%s1594_s4] ss:$0 sm:$0xff]  ;;  %v1372_v0 = vld [vmem:[#allocation2 + $0xf0] sm:$0xff]   ;;  %v1374_v2 = vld [vmem:[#allocation2 + $0xe8] sm:$0xff]  }
  0x18   :  { %1314 = vmatmul.mubr.msk.bf16.vlgmr.msra.gmra.mxu0 %vm70_vm0, %v1522_v4  ;;  %1188 = vmatpush3.bf16.msra.mxu1 %v1357_v12  ;;  %v1375_v5 = vld [vmem:[#allocation2 + $0xa8] sm:$0xff]   ;;  %v1376_v6 = vld [vmem:[#allocation2 + $0xe0] sm:$0xff]   ;;  %v1378_v8 = vld [vmem:[#allocation2 + $0xd8] sm:$0xff]  }
  0x19   :  { %1321 = vmatprep.mubr.msk.bf16.mxu0 %vm70_vm0, %v1514_v3  ;;  %1189 = vmatprep.subr.bf16.mxu1 %v1358_v13  ;;  %v1377_v7 = vld [vmem:[#allocation2 + $0xa0] sm:$0xff]   ;;  %v1379_v9 = vld [vmem:[#allocation2 + $0x98] sm:$0xff]   ;;  %v1380_v10 = vld [vmem:[#allocation2 + $0xd0] sm:$0xff]  }
  0x1a   :  { %v1381_v11 = vld [vmem:[#allocation2 + $0x90] sm:$0xff]   ;;  %v1382_v12 = vld [vmem:[#allocation2 + $0xc8] sm:$0xff]  }
  0x1b   :  { %v1383_v13 = vld [vmem:[#allocation2 + $0x88] sm:$0xff]  }
  0x1c   :  { %1190 = vmatpush3.bf16.msra.mxu1 %v1359_v14  ;;  %v1384_v14 = vld [vmem:[#allocation2 + $0xc0] sm:$0xff]  }
  0x1d   :  { %1191 = vmatprep.subr.bf16.mxu1 %v1360_v15  ;;  %v1385_v15 = vld [vmem:[#allocation2 + $0x80] sm:$0xff]  }
  0x20   :  { %1192 = vmatpush3.bf16.msra.mxu1 %v1361_v16 }
  0x21   :  { %1193 = vmatprep.subr.bf16.mxu1 %v1362_v17 }
  0x24   :  { %1194 = vmatpush3.bf16.msra.mxu1 %v1363_v18 }
  0x25   :  { %1195 = vmatprep.subr.bf16.mxu1 %v1364_v19 }
  0x28   :  { %1196 = vmatpush3.bf16.msra.mxu1 %v1365_v20 }
  0x29   :  { %1197 = vmatprep.subr.bf16.mxu1 %v1366_v21 }
  0x2c   :  { %1198 = vmatpush3.bf16.msra.mxu1 %v1367_v22 }
  0x2d   :  { %1199 = vmatprep.subr.bf16.mxu1 %v1368_v23 }
  0x30   :  { %1200 = vmatpush3.bf16.msra.mxu1 %v1369_v24 }
  0x8d   :  { %v1540_v25 = vpop.permute.xlu0 %128 }
  0x8e   :  { %v1542_v28 = vpop.permute.xlu1 %138 }
  0x91   :  { %v1544_v30 = vpop.permute.xlu0 %133 }
  0x92   :  { %v1548_v35 = vpop.permute.xlu1 %143 }
  0xd8   :  { %v1315_v26 = vpop.f32.mrf.mxu0 }
  0xd9   :  { %v148_v37 = vmul.f32 %v1315_v26, %v1542_v28 }
  0xda   :  { %v111_v27 = vpop.f32.mrf.mxu0 }
  0xdb   :  { %v146_v32 = vmul.f32 %v1540_v25, %v111_v27  ;;  %v1386_v27 = vld [vmem:[#allocation2 + $0x178] sm:$0xff]  }
  0xdc   :  { %v1316_v29 = vpop.f32.mrf.mxu0 }
  0xdd   :  { %v149_v36 = vmul.f32 %v1316_v29, %v1548_v35  ;;  %v1387_v29 = vld [vmem:[#allocation2 + $0x138] sm:$0xff]  }
  0xde   :  { %v114_v31 = vpop.f32.mrf.mxu0 }
  0xdf   :  { %v147_v33 = vmul.f32 %v1544_v30, %v114_v31  ;;  %v183_v38 = vpack.c.bf16 %v149_v36, %v148_v37  ;;  %v1388_v31 = vld [vmem:[#allocation2 + $0x170] sm:$0xff]   ;;  %v1392_v36 = vld [vmem:[#allocation2 + $0x160] sm:$0xff]  }
  0xe0   :  { %v1393_v37 = vld [vmem:[#allocation2 + $0x120] sm:$0xff]  }
  0xe1   :  { %v182_v34 = vpack.c.bf16 %v147_v33, %v146_v32  ;;  %v1389_v32 = vld [vmem:[#allocation2 + $0x130] sm:$0xff]   ;;  %v1390_v33 = vld [vmem:[#allocation2 + $0x168] sm:$0xff]  }
  0xe3   :  { %320 = vmatmul.mubr.bf16.vlgmr.msra.gmra.mxu1 %v182_v34  ;;  %v1391_v34 = vld [vmem:[#allocation2 + $0x128] sm:$0xff]  }
  0xe4   :  { %327 = vmatprep.mubr.bf16.mxu1 %v1505_v1  ;;  %v1373_v1 = vld [vmem:[#allocation2 + $0xb0] sm:$0xff]  }
  0xeb   :  { %328 = vmatmul.mubr.bf16.gmra.mxu1 %v183_v38  ;;  %v1394_v38 = vld [vmem:[#allocation2 + $0x158] sm:$0xff]  }
  0xec   :  { %1329 = vmatprep.mubr.msk.bf16.mxu1 %vm70_vm0, %v1514_v3 }
 0x1a3   :  { %v1201_v39 = vpop.f32.mrf.mxu1 }
 0x1a5   :  { %v1202_v40 = vpop.f32.mrf.mxu1 }
 0x1a6   :  { %v1203_v48 = vadd.f32 %v1202_v40, %v1201_v39  ;;  %v1395_v39 = vld [vmem:[#allocation2 + $0x118] sm:$0xff]   ;;  %v1396_v40 = vld [vmem:[#allocation2 + $0x150] sm:$0xff]  }
 0x1a7   :  { %v1204_v41 = vpop.f32.mrf.mxu1 }
 0x1a8   :  { %v322_v54 = vadd.f32 %v1203_v48, %v1104_v49 }
 0x1a9   :  { %v1205_v42 = vpop.f32.mrf.mxu1 }
 0x1aa   :  { %v1206_v45 = vadd.f32 %v1205_v42, %v1204_v41  ;;  %v336_v59 = vmax.f32 %v322_v54, 0.0 }
 0x1ab   :  { %v1207_v43 = vpop.f32.mrf.mxu1 }
 0x1ac   :  { %v325_v51 = vadd.f32 %v1206_v45, %v1104_v49 }
 0x1ad   :  { %v1208_v44 = vpop.f32.mrf.mxu1 }
 0x1ae   :  { %v1209_v46 = vadd.f32 %v1208_v44, %v1207_v43  ;;  %v337_v56 = vmax.f32 %v325_v51, 0.0  ;;  %v1124_v44 = vld [vmem:[%s1594_s4 + $0x1] ss:$0 sm:$0xff] }
 0x1af   :  { %v1210_v47 = vpop.f32.mrf.mxu1 }
 0x1b0   :  { %v330_v52 = vadd.f32 %v1209_v46, %v1104_v49  ;;  %v340_v61 = vpack.c.bf16 %v337_v56, %v336_v59 }
 0x1b1   :  { %v1211_v50 = vpop.f32.mrf.mxu1 }
 0x1b2   :  { %v1212_v53 = vadd.f32 %v1211_v50, %v1210_v47  ;;  %v338_v57 = vmax.f32 %v330_v52, 0.0 }
 0x1b4   :  { %v333_v55 = vadd.f32 %v1212_v53, %v1104_v49 }
 0x1b6   :  { %v339_v58 = vmax.f32 %v333_v55, 0.0 }
 0x1b8   :  { %v341_v60 = vpack.c.bf16 %v339_v58, %v338_v57 }
 0x1ba   :  { %1317 = vmatprep.subr.bf16.mxu0 %v341_v60 }
 0x1bb   :  { %1318 = vmatpush3.bf16.msra.mxu0 %v341_v60 }
 0x1bc   :  { %1319 = vmatprep.subr.bf16.mxu0 %v340_v61 }
 0x1bf   :  { %1320 = vmatpush3.bf16.msra.mxu0 %v340_v61 }
 0x1c0   :  { %1217 = vmatprep.subr.bf16.mxu0 %v1370_v62 }
 0x1c2   :  { %1322 = vmatmul.mubr.msk.bf16.vlgmr.msra.gmra.mxu0 %vm70_vm0, %v1522_v4 }
 0x1c3   :  { %566 = vmatprep.mubr.bf16.mxu0 %v340_v61  ;;  %1218 = vmatpush3.bf16.msra.mxu0 %v1371_v63 }
 0x1c4   :  { %1219 = vmatprep.subr.bf16.mxu0 %v1372_v0  ;;  %v1397_v0 = vld [vmem:[#allocation2 + $0x110] sm:$0xff]  }
 0x1c7   :  { %1220 = vmatpush3.bf16.msra.mxu0 %v1373_v1  ;;  %v1398_v1 = vld [vmem:[#allocation2 + $0x148] sm:$0xff]  }
 0x1c8   :  { %1221 = vmatprep.subr.bf16.mxu0 %v1374_v2  ;;  %v1399_v2 = vld [vmem:[#allocation2 + $0x108] sm:$0xff]  }
 0x1cb   :  { %1222 = vmatpush3.bf16.msra.mxu0 %v1375_v5  ;;  %v1400_v5 = vld [vmem:[#allocation2 + $0x140] sm:$0xff]  }
 0x1cc   :  { %1223 = vmatprep.subr.bf16.mxu0 %v1376_v6  ;;  %v1401_v6 = vld [vmem:[#allocation2 + $0x100] sm:$0xff]  }
 0x1cf   :  { %1224 = vmatpush3.bf16.msra.mxu0 %v1377_v7 }
 0x1d0   :  { %1225 = vmatprep.subr.bf16.mxu0 %v1378_v8 }
 0x1d3   :  { %1226 = vmatpush3.bf16.msra.mxu0 %v1379_v9 }
 0x1d4   :  { %1227 = vmatprep.subr.bf16.mxu0 %v1380_v10 }
 0x1d7   :  { %1228 = vmatpush3.bf16.msra.mxu0 %v1381_v11 }
 0x1d8   :  { %1229 = vmatprep.subr.bf16.mxu0 %v1382_v12 }
 0x1db   :  { %1230 = vmatpush3.bf16.msra.mxu0 %v1383_v13 }
 0x1dc   :  { %1231 = vmatprep.subr.bf16.mxu0 %v1384_v14 }
 0x1df   :  { %1232 = vmatpush3.bf16.msra.mxu0 %v1385_v15 }
 0x1e0   :  { %1249 = vmatprep.subr.bf16.mxu0 %v1386_v27  ;;  %v1144_v27 = vld [vmem:[%s1594_s4 + $0x2] ss:$0 sm:$0xff] }
 0x282   :  { %v1323_v16 = vpop.f32.mrf.mxu0 }
 0x283   :  { %v393_v24 = vmul.f32 %v1323_v16, %v1542_v28 }
 0x284   :  { %v376_v17 = vpop.f32.mrf.mxu0 }
 0x285   :  { %v391_v20 = vmul.f32 %v376_v17, %v1540_v25 }
 0x286   :  { %v1324_v18 = vpop.f32.mrf.mxu0 }
 0x287   :  { %v394_v23 = vmul.f32 %v1324_v18, %v1548_v35 }
 0x288   :  { %v379_v19 = vpop.f32.mrf.mxu0 }
 0x289   :  { %v392_v21 = vmul.f32 %v379_v19, %v1544_v30  ;;  %v429_v26 = vpack.c.bf16 %v394_v23, %v393_v24 }
 0x28b   :  { %v428_v22 = vpack.c.bf16 %v392_v21, %v391_v20 }
 0x28d   :  { %567 = vmatmul.mubr.bf16.vlgmr.msra.gmra.mxu0 %v428_v22 }
 0x28e   :  { %574 = vmatprep.mubr.bf16.mxu0 %v341_v60  ;;  %1250 = vmatpush3.bf16.msra.mxu0 %v1387_v29 }
 0x28f   :  { %1251 = vmatprep.subr.bf16.mxu0 %v1388_v31 }
 0x292   :  { %1252 = vmatpush3.bf16.msra.mxu0 %v1389_v32 }
 0x293   :  { %1253 = vmatprep.subr.bf16.mxu0 %v1390_v33 }
 0x295   :  { %575 = vmatmul.mubr.bf16.gmra.mxu0 %v429_v26 }
 0x296   :  { %1254 = vmatpush3.bf16.msra.mxu0 %v1391_v34 }
 0x297   :  { %1255 = vmatprep.subr.bf16.mxu0 %v1392_v36 }
 0x29a   :  { %1256 = vmatpush3.bf16.msra.mxu0 %v1393_v37 }
 0x29b   :  { %1257 = vmatprep.subr.bf16.mxu0 %v1394_v38 }
 0x29e   :  { %1258 = vmatpush3.bf16.msra.mxu0 %v1395_v39 }
 0x29f   :  { %1259 = vmatprep.subr.bf16.mxu0 %v1396_v40 }
 0x2a2   :  { %1260 = vmatpush3.bf16.msra.mxu0 %v1397_v0 }
 0x2a3   :  { %1261 = vmatprep.subr.bf16.mxu0 %v1398_v1 }
 0x2a6   :  { %1262 = vmatpush3.bf16.msra.mxu0 %v1399_v2 }
 0x2a7   :  { %1263 = vmatprep.subr.bf16.mxu0 %v1400_v5 }
 0x2aa   :  { %1264 = vmatpush3.bf16.msra.mxu0 %v1401_v6 }
 0x34d   :  { %v1233_v41 = vpop.f32.mrf.mxu0 }
 0x34f   :  { %v1234_v42 = vpop.f32.mrf.mxu0 }
 0x350   :  { %v1235_v43 = vadd.f32 %v1234_v42, %v1233_v41 }
 0x351   :  { %v1236_v45 = vpop.f32.mrf.mxu0 }
 0x352   :  { %v569_v47 = vadd.f32 %v1235_v43, %v1124_v44  ;;  %v1402_v43 = vld [vmem:[#allocation2 + $0x1f8] sm:$0xff]  }
 0x353   :  { %v1237_v46 = vpop.f32.mrf.mxu0 }
 0x354   :  { %v1238_v48 = vadd.f32 %v1237_v46, %v1236_v45  ;;  %v583_v52 = vmax.f32 %v569_v47, 0.0  ;;  %v1404_v45 = vld [vmem:[#allocation2 + $0x1f0] sm:$0xff]   ;;  %v1406_v47 = vld [vmem:[#allocation2 + $0x1e8] sm:$0xff]  }
 0x355   :  { %v1239_v49 = vpop.f32.mrf.mxu0  ;;  %v1405_v46 = vld [vmem:[#allocation2 + $0x1b0] sm:$0xff]  }
 0x356   :  { %v572_v50 = vadd.f32 %v1238_v48, %v1124_v44  ;;  %v1407_v48 = vld [vmem:[#allocation2 + $0x1a8] sm:$0xff]  }
 0x357   :  { %v1240_v51 = vpop.f32.mrf.mxu0 }
 0x358   :  { %v584_v53 = vmax.f32 %v572_v50, 0.0  ;;  %v1241_v54 = vadd.f32 %v1240_v51, %v1239_v49  ;;  %v1408_v49 = vld [vmem:[#allocation2 + $0x1e0] sm:$0xff]   ;;  %v1410_v51 = vld [vmem:[#allocation2 + $0x1d8] sm:$0xff]  }
 0x359   :  { %v1242_v55 = vpop.f32.mrf.mxu0  ;;  %v1409_v50 = vld [vmem:[#allocation2 + $0x1a0] sm:$0xff]  }
 0x35a   :  { %v587_v56 = vpack.c.bf16 %v584_v53, %v583_v52  ;;  %v577_v58 = vadd.f32 %v1241_v54, %v1124_v44  ;;  %v1411_v52 = vld [vmem:[#allocation2 + $0x198] sm:$0xff]   ;;  %v1412_v53 = vld [vmem:[#allocation2 + $0x1d0] sm:$0xff]   ;;  %v1414_v54 = vld [vmem:[#allocation2 + $0x1c8] sm:$0xff]  }
 0x35b   :  { %v1243_v57 = vpop.f32.mrf.mxu0 }
 0x35c   :  { %v1244_v59 = vadd.f32 %v1243_v57, %v1242_v55  ;;  %813 = vmatprep.mubr.bf16.mxu0 %v587_v56  ;;  %v585_v61 = vmax.f32 %v577_v58, 0.0  ;;  %v1415_v55 = vld [vmem:[#allocation2 + $0x188] sm:$0xff]   ;;  %v1417_v57 = vld [vmem:[#allocation2 + $0x180] sm:$0xff]  }
 0x35e   :  { %v580_v60 = vadd.f32 %v1244_v59, %v1124_v44  ;;  %v1403_v44 = vld [vmem:[#allocation2 + $0x1b8] sm:$0xff]  }
 0x360   :  { %v586_v62 = vmax.f32 %v580_v60, 0.0 }
 0x362   :  { %v588_v63 = vpack.c.bf16 %v586_v62, %v585_v61 }
 0x364   :  { %1325 = vmatprep.subr.bf16.mxu1 %v588_v63 }
 0x365   :  { %1326 = vmatpush3.bf16.msra.mxu1 %v588_v63 }
 0x366   :  { %1327 = vmatprep.subr.bf16.mxu1 %v587_v56 }
 0x369   :  { %1328 = vmatpush3.bf16.msra.mxu1 %v587_v56  ;;  %v1416_v56 = vld [vmem:[#allocation2 + $0x1c0] sm:$0xff]  }
 0x36c   :  { %1330 = vmatmul.mubr.msk.bf16.vlgmr.msra.gmra.mxu1 %vm70_vm0, %v1522_v4 }
 0x36d   :  { %1337 = vmatprep.mubr.msk.bf16.mxu1 %vm70_vm0, %v1514_v3 }
 0x42c   :  { %v1331_v7 = vpop.f32.mrf.mxu1 }
 0x42d   :  { %v640_v14 = vmul.f32 %v1331_v7, %v1542_v28  ;;  %v1164_v7 = vld [vmem:[%s1594_s4 + $0x3] ss:$0 sm:$0xff]  ;;  %s1438_s4 = scalar_lea.vmem %s1087_s21, 512 }
 0x42e   :  { %v623_v8 = vpop.f32.mrf.mxu1  ;;  %p1439_p5 = scmp.ne.s32.totalorder %s1087_s21, %s1438_s4  ;;  %p1444_p7 = scmp.lt.s32.totalorder %s1438_s4, %s1438_s4 }
 0x42f   :  { %v638_v11 = vmul.f32 %v623_v8, %v1540_v25 }
 0x430   :  { %v1332_v9 = vpop.f32.mrf.mxu1  ;;  %p1445_p8 = por %p1444_p7, %p1443_p6 }
 0x431   :  { %v641_v3 = vmul.f32 %v1332_v9, %v1548_v35 }
 0x432   :  { %v626_v10 = vpop.f32.mrf.mxu1  ;;  %p1446_p9 = pnand %p1445_p8, %p1439_p5 }
 0x433   :  { %v639_v12 = vmul.f32 %v626_v10, %v1544_v30  ;;  %v676_v15 = vpack.c.bf16 %v641_v3, %v640_v14 }
 0x435   :  { %v675_v13 = vpack.c.bf16 %v639_v12, %v638_v11 }
 0x437   :  { %814 = vmatmul.mubr.bf16.vlgmr.msra.gmra.mxu0 %v675_v13 }
 0x438   :  { %821 = vmatprep.mubr.bf16.mxu0 %v588_v63 }
 0x43f   :  { %822 = vmatmul.mubr.bf16.gmra.mxu0 %v676_v15 }
 0x4f7   :  { %v1265_v16 = vpop.f32.mrf.mxu0 }
 0x4f9   :  { %v1266_v17 = vpop.f32.mrf.mxu0 }
 0x4fa   :  { %v1267_v26 = vadd.f32 %v1266_v17, %v1265_v16 }
 0x4fb   :  { %v1268_v18 = vpop.f32.mrf.mxu0 }
 0x4fc   :  { %v816_v34 = vadd.f32 %v1267_v26, %v1144_v27 }
 0x4fd   :  { %v1269_v19 = vpop.f32.mrf.mxu0 }
 0x4fe   :  { %v1270_v22 = vadd.f32 %v1269_v19, %v1268_v18  ;;  %v830_v40 = vmax.f32 %v816_v34, 0.0 }
 0x4ff   :  { %v1271_v20 = vpop.f32.mrf.mxu0 }
 0x500   :  { %v819_v31 = vadd.f32 %v1270_v22, %v1144_v27 }
 0x501   :  { %v1272_v21 = vpop.f32.mrf.mxu0 }
 0x502   :  { %v1273_v23 = vadd.f32 %v1272_v21, %v1271_v20  ;;  %v831_v37 = vmax.f32 %v819_v31, 0.0 }
 0x503   :  { %v1274_v24 = vpop.f32.mrf.mxu0 }
 0x504   :  { %v824_v32 = vadd.f32 %v1273_v23, %v1144_v27  ;;  %v834_v42 = vpack.c.bf16 %v831_v37, %v830_v40 }
 0x505   :  { %v1275_v29 = vpop.f32.mrf.mxu0 }
 0x506   :  { %v1276_v33 = vadd.f32 %v1275_v29, %v1274_v24  ;;  %v832_v38 = vmax.f32 %v824_v32, 0.0 }
 0x508   :  { %v827_v36 = vadd.f32 %v1276_v33, %v1144_v27 }
 0x50a   :  { %v833_v39 = vmax.f32 %v827_v36, 0.0 }
 0x50c   :  { %v835_v41 = vpack.c.bf16 %v833_v39, %v832_v38 }
 0x50e   :  { %1333 = vmatprep.subr.bf16.mxu1 %v835_v41 }
 0x50f   :  { %1334 = vmatpush3.bf16.msra.mxu1 %v835_v41 }
 0x510   :  { %1335 = vmatprep.subr.bf16.mxu1 %v834_v42 }
 0x513   :  { %1336 = vmatpush3.bf16.msra.mxu1 %v834_v42 }
 0x514   :  { %1281 = vmatprep.subr.bf16.mxu1 %v1402_v43 }
 0x516   :  { %1338 = vmatmul.mubr.msk.bf16.vlgmr.msra.gmra.mxu1 %vm70_vm0, %v1522_v4  ;;  %v1413_v4 = vld [vmem:[#allocation2 + $0x190] sm:$0xff]  }
 0x517   :  { %1060 = vmatprep.mubr.bf16.mxu1 %v834_v42  ;;  %1282 = vmatpush3.bf16.msra.mxu1 %v1403_v44 }
 0x518   :  { %1283 = vmatprep.subr.bf16.mxu1 %v1404_v45 }
 0x51b   :  { %1284 = vmatpush3.bf16.msra.mxu1 %v1405_v46 }
 0x51c   :  { %1285 = vmatprep.subr.bf16.mxu1 %v1406_v47 }
 0x51f   :  { %1286 = vmatpush3.bf16.msra.mxu1 %v1407_v48 }
 0x520   :  { %1287 = vmatprep.subr.bf16.mxu1 %v1408_v49 }
 0x523   :  { %1288 = vmatpush3.bf16.msra.mxu1 %v1409_v50 }
 0x524   :  { %1289 = vmatprep.subr.bf16.mxu1 %v1410_v51 }
 0x527   :  { %1290 = vmatpush3.bf16.msra.mxu1 %v1411_v52 }
 0x528   :  { %1291 = vmatprep.subr.bf16.mxu1 %v1412_v53 }
 0x52b   :  { %1292 = vmatpush3.bf16.msra.mxu1 %v1413_v4 }
 0x52c   :  { %1293 = vmatprep.subr.bf16.mxu1 %v1414_v54 }
 0x52f   :  { %1294 = vmatpush3.bf16.msra.mxu1 %v1415_v55 }
 0x530   :  { %1295 = vmatprep.subr.bf16.mxu1 %v1416_v56 }
 0x533   :  { %1296 = vmatpush3.bf16.msra.mxu1 %v1417_v57 }
 0x5d6   :  { %v1339_v58 = vpop.f32.mrf.mxu1 }
 0x5d7   :  { %v887_v2 = vmul.f32 %v1339_v58, %v1542_v28 }
 0x5d8   :  { %v870_v59 = vpop.f32.mrf.mxu1 }
 0x5d9   :  { %v885_v62 = vmul.f32 %v870_v59, %v1540_v25 }
 0x5da   :  { %v1340_v60 = vpop.f32.mrf.mxu1 }
 0x5db   :  { %v888_v1 = vmul.f32 %v1340_v60, %v1548_v35 }
 0x5dc   :  { %v873_v61 = vpop.f32.mrf.mxu1 }
 0x5dd   :  { %v886_v63 = vmul.f32 %v873_v61, %v1544_v30  ;;  %v923_v5 = vpack.c.bf16 %v888_v1, %v887_v2 }
 0x5df   :  { %v922_v0 = vpack.c.bf16 %v886_v63, %v885_v62 }
 0x5e1   :  { %1061 = vmatmul.mubr.bf16.vlgmr.msra.gmra.mxu1 %v922_v0 }
 0x5e2   :  { %1068 = vmatprep.mubr.bf16.mxu1 %v835_v41 }
 0x5e9   :  { %1069 = vmatmul.mubr.bf16.gmra.mxu1 %v923_v5 }
 0x6a1   :  { %v1297_v6 = vpop.f32.mrf.mxu1 }
 0x6a3   :  { %v1298_v8 = vpop.f32.mrf.mxu1 }
 0x6a4   :  { %v1299_v9 = vadd.f32 %v1298_v8, %v1297_v6 }
 0x6a5   :  { %v1300_v10 = vpop.f32.mrf.mxu1 }
 0x6a6   :  { %v1063_v25 = vadd.f32 %v1299_v9, %v1164_v7 }
 0x6a7   :  { %v1301_v11 = vpop.f32.mrf.mxu1 }
 0x6a8   :  { %1077 = vst [vmem:[#allocation5] sm:$0xff] %v1063_v25  ;;  %v1302_v30 = vadd.f32 %v1301_v11, %v1300_v10 }
 0x6a9   :  { %v1303_v12 = vpop.f32.mrf.mxu1 }
 0x6aa   :  { %v1066_v13 = vadd.f32 %v1302_v30, %v1164_v7 }
 0x6ab   :  { %v1304_v3 = vpop.f32.mrf.mxu1 }
 0x6ac   :  { %1078 = vst [vmem:[#allocation5 + $0x8] sm:$0xff] %v1066_v13  ;;  %v1305_v35 = vadd.f32 %v1304_v3, %v1303_v12 }
 0x6ad   :  { %v1306_v28 = vpop.f32.mrf.mxu1 }
 0x6ae   :  { %v1071_v14 = vadd.f32 %v1305_v35, %v1164_v7 }
 0x6af   :  { %v1307_v15 = vpop.f32.mrf.mxu1 }
 0x6b0   :  { %1079 = vst [vmem:[#allocation5 + $0x10] sm:$0xff] %v1071_v14  ;;  %v1308_v16 = vadd.f32 %v1307_v15, %v1306_v28 }
 0x6b2   :  { %v1074_v17 = vadd.f32 %v1308_v16, %v1164_v7 }
 0x6b4   :  { %1080 = vst [vmem:[#allocation5 + $0x18] sm:$0xff] %v1074_v17 }
 0x6b5   :  { %1449 = shalt.err (!%p1446_p9)
}
 0x6b6   :  { %s1467_s22 = smov 128   ;;  %s1468_s23 = smov 8  }
 0x6b7   :  { %1092 = dma.vmem_to_hbm [thread:$0]  %s1087_s21, 512, %s1595_s5, [#allocation4], %s1467_s22, %s1467_s22, %s1468_s23  }
 0x6b8   :  { %1460 = dma.done.wait [#allocation4], 512  }
 0x6b9   :  { %1461 = vsyncadd [#allocation4], 4294966784 }
 0x6ba   :  { %1096 = vsyncpa [#allocation3], 1 }
 0x6bb   :  { %1097 = vsyncpa [#allocation4], 1 }

</bundles_post_ra>
